<compile_context>
chip_gen: v6e
topology: v6e:2x2x1
jax: 0.10.0
libtpu: 0.0.40
codegen_flags: <defaults>
</compile_context>

<pallas_src>
import jax
import jax.numpy as jnp
import numpy as np
from jax.experimental import pallas as pl
from jax.experimental.pallas import tpu as pltpu


# ---------------------------------------------------------------------------
# Fused kernel: p_mu MLP + per-batch-tile column partial sums.
# One grid step processes one (TB, x_dim)/(TB, y_dim) batch tile in VMEM.
# ---------------------------------------------------------------------------
def _clubmean_kernel(x_ref, y_ref, w1_ref, b1_ref, w2_ref, b2_ref,
                     muy_ref, musum_ref, ysum_ref):
    """Per batch tile t, emits (1, 1, y_dim) partials:

        muy[t, 0, d]   = sum_i mu[i, d] * y[i, d]
        musum[t, 0, d] = sum_i mu[i, d]
        ysum[t, 0, d]  = sum_i y[i, d]

    The exact CLUBMean forward is recovered from these in the wrapper.
    """
    x = x_ref[...]                                   # (TB, x_dim) f32
    y = y_ref[...]                                   # (TB, y_dim) f32

    # p_mu: Linear -> ReLU -> Linear.  bf16-stored weights upcast in VMEM;
    # both matmuls run with f32 accumulation on the MXU.
    w1 = w1_ref[...].astype(jnp.float32)
    w2 = w2_ref[...].astype(jnp.float32)
    h = jnp.dot(x, w1, preferred_element_type=jnp.float32) + b1_ref[...]
    h = jnp.maximum(h, 0.0)
    mu = jnp.dot(h, w2, preferred_element_type=jnp.float32) + b2_ref[...]   # (TB, y_dim)

    # Lane-dense (1, 1, y_dim) partial outputs; sublane (axis=0) reductions only.
    muy_ref[...] = jnp.sum(mu * y, axis=0, keepdims=True)[None]
    musum_ref[...] = jnp.sum(mu, axis=0, keepdims=True)[None]
    ysum_ref[...] = jnp.sum(y, axis=0, keepdims=True)[None]


# ---------------------------------------------------------------------------
# Wrapper: CLUBMean.forward with the default two-layer p_mu (hidden_size=512).
# ---------------------------------------------------------------------------
def club_mean_forward(params, x_samples, y_samples, *, batch_tile=256):
    """CLUBMean.forward as one fused pallas_call + a tiny JAX combine.

    Exact rewrite of the PyTorch pairwise formulation (after the batch mean):
        forward = (1/B) * ( S_muy - (1/B) * <S_mu, S_y> )
    """
    # TODO(synk): the hidden_size=None constructor branch (single Linear p_mu)
    # is not wired up; only the default Linear->ReLU->Linear path is implemented.
    B, x_dim = x_samples.shape
    _, y_dim = y_samples.shape
    hidden = params["w1"].shape[1]

    tb = min(B, batch_tile)
    if B % tb != 0:
        raise ValueError(f"batch {B} must be divisible by batch tile {tb}")
    num_tiles = B // tb

    b1 = params["b1"].astype(jnp.float32).reshape(1, hidden)
    b2 = params["b2"].astype(jnp.float32).reshape(1, y_dim)

    partial_shape = jax.ShapeDtypeStruct((num_tiles, 1, y_dim), jnp.float32)
    part_spec = pl.BlockSpec((1, 1, y_dim), lambda t: (t, 0, 0))

    p_muy, p_mu, p_y = pl.pallas_call(
        _clubmean_kernel,
        out_shape=(partial_shape, partial_shape, partial_shape),
        grid=(num_tiles,),
        in_specs=[
            pl.BlockSpec((tb, x_dim), lambda t: (t, 0)),        # x batch tile
            pl.BlockSpec((tb, y_dim), lambda t: (t, 0)),        # y batch tile
            pl.BlockSpec((x_dim, hidden), lambda t: (0, 0)),    # W1 (grid-invariant, bf16)
            pl.BlockSpec((1, hidden), lambda t: (0, 0)),        # b1 (f32)
            pl.BlockSpec((hidden, y_dim), lambda t: (0, 0)),    # W2 (grid-invariant, bf16)
            pl.BlockSpec((1, y_dim), lambda t: (0, 0)),         # b2 (f32)
        ],
        out_specs=(part_spec, part_spec, part_spec),
        compiler_params=pltpu.CompilerParams(
            # Tiles are fully independent -> megacore-shardable on v7x.
            dimension_semantics=("parallel",),
        ),
    )(x_samples, y_samples, params["w1"], b1, params["w2"], b2)

    # Tiny final combine in JAX (O(num_tiles * y_dim) work).
    inv_b = 1.0 / B
    s_muy = jnp.sum(p_muy)
    s_mu = jnp.sum(p_mu, axis=(0, 1))        # (y_dim,)
    s_y = jnp.sum(p_y, axis=(0, 1))          # (y_dim,)
    return inv_b * (s_muy - inv_b * jnp.sum(s_mu * s_y))


# ---------------------------------------------------------------------------
# Pure-JAX reference (faithful to the PyTorch pairwise broadcast formulation).
# Uses the same (bf16-stored) weight values, upcast to f32 for the math.
# ---------------------------------------------------------------------------
def _ref_forward(params, x, y):
    w1 = params["w1"].astype(jnp.float32)
    w2 = params["w2"].astype(jnp.float32)
    h = jnp.maximum(x @ w1 + params["b1"], 0.0)
    mu = h @ w2 + params["b2"]
    positive = -((mu - y) ** 2) / 2.0
    negative = -jnp.mean((y[None, :, :] - mu[:, None, :]) ** 2, axis=1) / 2.0
    return jnp.mean(positive.sum(-1) - negative.sum(-1))


def init_params(key, x_dim, hidden, y_dim, *, weights_dtype=jnp.bfloat16):
    k1, k2, k3, k4 = jax.random.split(key, 4)
    s = 0.02
    return {
        # Weights stored in bf16 (halves the dominant weight HBM traffic);
        # forward math stays f32.  Biases kept f32 (negligible size).
        "w1": (jax.random.normal(k1, (x_dim, hidden), jnp.float32) * s).astype(weights_dtype),
        "b1": jax.random.normal(k2, (hidden,), jnp.float32) * s,
        "w2": (jax.random.normal(k3, (hidden, y_dim), jnp.float32) * s).astype(weights_dtype),
        "b2": jax.random.normal(k4, (y_dim,), jnp.float32) * s,
    }


if __name__ == "__main__":
    B, X_DIM, Y_DIM, HIDDEN = 8, 256, 128, 512   # module defaults (hidden_size=512)

    key = jax.random.PRNGKey(0)
    kp, kx, ky = jax.random.split(key, 3)
    params = init_params(kp, X_DIM, HIDDEN, Y_DIM)
    x_samples = jax.random.normal(kx, (B, X_DIM), jnp.float32)
    y_samples = jax.random.normal(ky, (B, Y_DIM), jnp.float32)

    out = jax.block_until_ready(jax.jit(club_mean_forward)(params, x_samples, y_samples))
    ref = _ref_forward(params, x_samples, y_samples)

    assert out.shape == ()
    np.testing.assert_allclose(np.asarray(out), np.asarray(ref), rtol=1e-3, atol=1e-3)

    print("KERNEL_OK")
</pallas_src>

<mosaic_0001>
module attributes {stable_mosaic.version = 11 : i64} {
  func.func @_clubmean_kernel(%arg0: i32, %arg1: memref<8x256xf32, #tpu.memory_space<vmem>>, %arg2: memref<8x128xf32, #tpu.memory_space<vmem>>, %arg3: memref<256x512xbf16, #tpu.memory_space<vmem>>, %arg4: memref<1x512xf32, #tpu.memory_space<vmem>>, %arg5: memref<512x128xbf16, #tpu.memory_space<vmem>>, %arg6: memref<1x128xf32, #tpu.memory_space<vmem>>, %arg7: memref<1x1x128xf32, #tpu.memory_space<vmem>>, %arg8: memref<1x1x128xf32, #tpu.memory_space<vmem>>, %arg9: memref<1x1x128xf32, #tpu.memory_space<vmem>>) attributes {dimension_semantics = [#tpu.dimension_semantics<parallel>], iteration_bounds = array<i64: 1>, scalar_prefetch = 0 : i64, scratch_operands = 0 : i64, tpu.core_type = #tpu.core_type<tc>, window_params = [{transform_indices = @transform_0, window_bounds = array<i64: 8, 256>}, {transform_indices = @transform_1, window_bounds = array<i64: 8, 128>}, {pipeline_mode = #tpu.pipeline_mode<synchronous>, transform_indices = @transform_2, window_bounds = array<i64: 256, 512>}, {pipeline_mode = #tpu.pipeline_mode<synchronous>, transform_indices = @transform_3, window_bounds = array<i64: 1, 512>}, {pipeline_mode = #tpu.pipeline_mode<synchronous>, transform_indices = @transform_4, window_bounds = array<i64: 512, 128>}, {pipeline_mode = #tpu.pipeline_mode<synchronous>, transform_indices = @transform_5, window_bounds = array<i64: 1, 128>}, {transform_indices = @transform_6, window_bounds = array<i64: 1, 1, 128>}, {transform_indices = @transform_7, window_bounds = array<i64: 1, 1, 128>}, {transform_indices = @transform_8, window_bounds = array<i64: 1, 1, 128>}]} {
    %c0 = arith.constant 0 : index
    %c0_0 = arith.constant 0 : index
    %0 = vector.load %arg1[%c0, %c0_0] : memref<8x256xf32, #tpu.memory_space<vmem>>, vector<8x256xf32>
    %c0_1 = arith.constant 0 : index
    %c0_2 = arith.constant 0 : index
    %1 = vector.load %arg2[%c0_1, %c0_2] : memref<8x128xf32, #tpu.memory_space<vmem>>, vector<8x128xf32>
    %c0_3 = arith.constant 0 : index
    %c0_4 = arith.constant 0 : index
    %2 = vector.load %arg3[%c0_3, %c0_4] : memref<256x512xbf16, #tpu.memory_space<vmem>>, vector<256x512xbf16>
    %3 = arith.extf %2 : vector<256x512xbf16> to vector<256x512xf32>
    %c0_5 = arith.constant 0 : index
    %c0_6 = arith.constant 0 : index
    %4 = vector.load %arg5[%c0_5, %c0_6] : memref<512x128xbf16, #tpu.memory_space<vmem>>, vector<512x128xbf16>
    %5 = arith.extf %4 : vector<512x128xbf16> to vector<512x128xf32>
    %cst = arith.constant dense<0.000000e+00> : vector<8x512xf32>
    %6 = tpu.matmul %0, %3, %cst {dimension_numbers = #tpu.dot_dimension_numbers<[1], [0], [0], [1], [0, 0, 1, 1], [], []>} : vector<8x256xf32>, vector<256x512xf32>, vector<8x512xf32> -> vector<8x512xf32>
    %c0_7 = arith.constant 0 : index
    %c0_8 = arith.constant 0 : index
    %7 = vector.load %arg4[%c0_7, %c0_8] : memref<1x512xf32, #tpu.memory_space<vmem>>, vector<1x512xf32>
    %8 = vector.broadcast %7 : vector<1x512xf32> to vector<8x512xf32>
    %9 = arith.addf %6, %8 : vector<8x512xf32>
    %cst_9 = arith.constant 0.000000e+00 : f32
    %10 = vector.broadcast %cst_9 : f32 to vector<8x512xf32>
    %11 = arith.maximumf %9, %10 : vector<8x512xf32>
    %cst_10 = arith.constant dense<0.000000e+00> : vector<8x128xf32>
    %12 = tpu.matmul %11, %5, %cst_10 {dimension_numbers = #tpu.dot_dimension_numbers<[1], [0], [0], [1], [0, 0, 1, 1], [], []>} : vector<8x512xf32>, vector<512x128xf32>, vector<8x128xf32> -> vector<8x128xf32>
    %c0_11 = arith.constant 0 : index
    %c0_12 = arith.constant 0 : index
    %13 = vector.load %arg6[%c0_11, %c0_12] : memref<1x128xf32, #tpu.memory_space<vmem>>, vector<1x128xf32>
    %14 = vector.broadcast %13 : vector<1x128xf32> to vector<8x128xf32>
    %15 = arith.addf %12, %14 : vector<8x128xf32>
    %16 = arith.mulf %15, %1 : vector<8x128xf32>
    %cst_13 = arith.constant dense<0.000000e+00> : vector<128xf32>
    %17 = vector.multi_reduction <add>, %16, %cst_13 [0] : vector<8x128xf32> to vector<128xf32>
    %18 = vector.shape_cast %17 : vector<128xf32> to vector<1x128xf32>
    %19 = vector.shape_cast %18 : vector<1x128xf32> to vector<1x1x128xf32>
    %c0_14 = arith.constant 0 : index
    %c0_15 = arith.constant 0 : index
    %c0_16 = arith.constant 0 : index
    %20 = vector.load %arg7[%c0_14, %c0_15, %c0_16] : memref<1x1x128xf32, #tpu.memory_space<vmem>>, vector<1x1x128xf32>
    tpu.vector_store %arg7[%c0_14, %c0_15, %c0_16], %19 {strides = array<i32>} : memref<1x1x128xf32, #tpu.memory_space<vmem>>, vector<1x1x128xf32>,
    %cst_17 = arith.constant dense<0.000000e+00> : vector<128xf32>
    %21 = vector.multi_reduction <add>, %15, %cst_17 [0] : vector<8x128xf32> to vector<128xf32>
    %22 = vector.shape_cast %21 : vector<128xf32> to vector<1x128xf32>
    %23 = vector.shape_cast %22 : vector<1x128xf32> to vector<1x1x128xf32>
    %c0_18 = arith.constant 0 : index
    %c0_19 = arith.constant 0 : index
    %c0_20 = arith.constant 0 : index
    %24 = vector.load %arg8[%c0_18, %c0_19, %c0_20] : memref<1x1x128xf32, #tpu.memory_space<vmem>>, vector<1x1x128xf32>
    tpu.vector_store %arg8[%c0_18, %c0_19, %c0_20], %23 {strides = array<i32>} : memref<1x1x128xf32, #tpu.memory_space<vmem>>, vector<1x1x128xf32>,
    %cst_21 = arith.constant dense<0.000000e+00> : vector<128xf32>
    %25 = vector.multi_reduction <add>, %1, %cst_21 [0] : vector<8x128xf32> to vector<128xf32>
    %26 = vector.shape_cast %25 : vector<128xf32> to vector<1x128xf32>
    %27 = vector.shape_cast %26 : vector<1x128xf32> to vector<1x1x128xf32>
    %c0_22 = arith.constant 0 : index
    %c0_23 = arith.constant 0 : index
    %c0_24 = arith.constant 0 : index
    %28 = vector.load %arg9[%c0_22, %c0_23, %c0_24] : memref<1x1x128xf32, #tpu.memory_space<vmem>>, vector<1x1x128xf32>
    tpu.vector_store %arg9[%c0_22, %c0_23, %c0_24], %27 {strides = array<i32>} : memref<1x1x128xf32, #tpu.memory_space<vmem>>, vector<1x1x128xf32>,
    return
  }
  func.func @transform_0(%arg0: i32) -> (i32, i32) {
    %c0_i32 = arith.constant 0 : i32
    %c0_i32_0 = arith.constant 0 : i32
    return %arg0, %c0_i32 : i32, i32
  }
  func.func @transform_1(%arg0: i32) -> (i32, i32) {
    %c0_i32 = arith.constant 0 : i32
    %c0_i32_0 = arith.constant 0 : i32
    return %arg0, %c0_i32 : i32, i32
  }
  func.func @transform_2(%arg0: i32) -> (i32, i32) {
    %c0_i32 = arith.constant 0 : i32
    %c0_i32_0 = arith.constant 0 : i32
    %c0_i32_1 = arith.constant 0 : i32
    return %c0_i32, %c0_i32_0 : i32, i32
  }
  func.func @transform_3(%arg0: i32) -> (i32, i32) {
    %c0_i32 = arith.constant 0 : i32
    %c0_i32_0 = arith.constant 0 : i32
    %c0_i32_1 = arith.constant 0 : i32
    return %c0_i32, %c0_i32_0 : i32, i32
  }
  func.func @transform_4(%arg0: i32) -> (i32, i32) {
    %c0_i32 = arith.constant 0 : i32
    %c0_i32_0 = arith.constant 0 : i32
    %c0_i32_1 = arith.constant 0 : i32
    return %c0_i32, %c0_i32_0 : i32, i32
  }
  func.func @transform_5(%arg0: i32) -> (i32, i32) {
    %c0_i32 = arith.constant 0 : i32
    %c0_i32_0 = arith.constant 0 : i32
    %c0_i32_1 = arith.constant 0 : i32
    return %c0_i32, %c0_i32_0 : i32, i32
  }
  func.func @transform_6(%arg0: i32) -> (i32, i32, i32) {
    %c0_i32 = arith.constant 0 : i32
    %c0_i32_0 = arith.constant 0 : i32
    %c0_i32_1 = arith.constant 0 : i32
    return %arg0, %c0_i32, %c0_i32_0 : i32, i32, i32
  }
  func.func @transform_7(%arg0: i32) -> (i32, i32, i32) {
    %c0_i32 = arith.constant 0 : i32
    %c0_i32_0 = arith.constant 0 : i32
    %c0_i32_1 = arith.constant 0 : i32
    return %arg0, %c0_i32, %c0_i32_0 : i32, i32, i32
  }
  func.func @transform_8(%arg0: i32) -> (i32, i32, i32) {
    %c0_i32 = arith.constant 0 : i32
    %c0_i32_0 = arith.constant 0 : i32
    %c0_i32_1 = arith.constant 0 : i32
    return %arg0, %c0_i32, %c0_i32_0 : i32, i32, i32
  }
}

</mosaic_0001>

<bundles_post_ra>
// kernel: club_mean_forward.1
= control target key start
LH: loop header
LB: loop body
LE: loop exit
PB: predicated region body
PF: predicated region fallthrough
CT: control target
= control target key end

     0   :  { %14 = vsyncpa [#allocation3], 0  ;;  %s1156_s0 = inlined_call_operand.hbm [shape: f32[8,256], index: 0, kind: input, shape index: {}]   ;;  %s1157_s1 = inlined_call_operand.vmem [shape: f32[8,128], index: 1, kind: input, shape index: {}]   ;;  %s1158_s2 = inlined_call_operand.hbm [shape: bf16[256,512], index: 2, kind: input, shape index: {}]   ;;  %s1159_s3 = inlined_call_operand.hbm [shape: f32[1,512], index: 3, kind: input, shape index: {}]   ;;  %s1160_s4 = inlined_call_operand.hbm [shape: bf16[512,128], index: 4, kind: input, shape index: {}]   ;;  %s1161_s5 = inlined_call_operand.vmem [shape: f32[1,128], index: 5, kind: input, shape index: {}]   ;;  %s1162_s6 = inlined_call_operand.vmem [shape: f32[1,1,128], index: 6, kind: output, shape index: {0}]   ;;  %s1163_s7 = inlined_call_operand.vmem [shape: f32[1,1,128], index: 7, kind: output, shape index: {1}]   ;;  %s1164_s8 = inlined_call_operand.vmem [shape: f32[1,1,128], index: 8, kind: output, shape index: {2}]  }
   0x1   :  { %15 = vsyncpa [#allocation5], 0 }
   0x2   :  { %16 = vsyncpa [#allocation8], 0  ;;  %s1076_s27 = smov [#allocation4]  }
   0x3   :  { %s34_s28 = sshll.u32 %s1076_s27, 4  ;;  %s35_s28 = int_to_ptr.vmem [resolvable:$true] %s34_s28 }
   0x4   :  { %s998_s29 = scalar_lea.vmem %s35_s28, 8192  ;;  %p1003_p1 = scmp.lt.s32.totalorder %s35_s28, %s35_s28 }
   0x5   :  { %p999_p0 = scmp.ne.s32.totalorder %s35_s28, %s998_s29  ;;  %p1004_p2 = scmp.lt.s32.totalorder %s998_s29, %s998_s29 }
   0x7   :  { %p1005_p3 = por %p1004_p2, %p1003_p1 }
   0x9   :  { %p1006_p4 = pnand %p1005_p3, %p999_p0 }
   0xb   :  { %1009 = shalt.err (!%p1006_p4)
}
   0xc   :  { %s1077_s30 = smov 256   ;;  %s1078_s9 = smov 16  }
   0xd   :  { %40 = dma.hbm_to_vmem [thread:$0]  %s1158_s2, 8192, %s35_s28, [#allocation5], %s1077_s30, %s1077_s30, %s1078_s9  }
   0xe   :  { %s1079_s12 = smov [#allocation2]   ;;  %s1080_s14 = smov [#allocation6]  }
   0xf   :  { %s23_s13 = sshll.u32 %s1079_s12, 4  ;;  %s47_s15 = sshll.u32 %s1080_s14, 4  ;;  %s24_s13 = int_to_ptr.vmem [resolvable:$true] %s23_s13  ;;  %s48_s15 = int_to_ptr.vmem [resolvable:$true] %s47_s15 }
  0x10   :  { %s1018_s16 = scalar_lea.vmem %s24_s13, 256  ;;  %p1023_p6 = scmp.lt.s32.totalorder %s24_s13, %s24_s13 }
  0x11   :  { %p1019_p5 = scmp.ne.s32.totalorder %s24_s13, %s1018_s16  ;;  %p1024_p7 = scmp.lt.s32.totalorder %s1018_s16, %s1018_s16 }
  0x13   :  { %p1025_p8 = por %p1024_p7, %p1023_p6 }
  0x15   :  { %p1026_p9 = pnand %p1025_p8, %p1019_p5 }
  0x17   :  { %1029 = shalt.err (!%p1026_p9)
}
  0x18   :  { %26 = dma.hbm_to_vmem [thread:$0]  %s1156_s0, 256, %s24_s13, [#allocation3]  }
  0x19   :  { %s1038_s19 = scalar_lea.vmem %s48_s15, 64  ;;  %p1043_p11 = scmp.lt.s32.totalorder %s48_s15, %s48_s15 }
  0x1a   :  { %p1039_p10 = scmp.ne.s32.totalorder %s48_s15, %s1038_s19  ;;  %p1044_p12 = scmp.lt.s32.totalorder %s1038_s19, %s1038_s19 }
  0x1c   :  { %p1045_p13 = por %p1044_p12, %p1043_p11 }
  0x1e   :  { %p1046_p0 = pnand %p1045_p13, %p1039_p10 }
  0x20   :  { %1049 = shalt.err (!%p1046_p0)
}
  0x21   :  { %50 = dma.hbm_to_vmem [thread:$0]  %s1159_s3, 64, %s48_s15, [#allocation5]  }
  0x22   :  { %s1081_s21 = smov [#allocation7]  }
  0x23   :  { %s56_s22 = sshll.u32 %s1081_s21, 4  ;;  %s57_s22 = int_to_ptr.vmem [resolvable:$true] %s56_s22 }
  0x24   :  { %s1058_s23 = scalar_lea.vmem %s57_s22, 4096  ;;  %p1063_p2 = scmp.lt.s32.totalorder %s57_s22, %s57_s22 }
  0x25   :  { %p1059_p1 = scmp.ne.s32.totalorder %s57_s22, %s1058_s23  ;;  %p1064_p3 = scmp.lt.s32.totalorder %s1058_s23, %s1058_s23 }
  0x27   :  { %p1065_p4 = por %p1064_p3, %p1063_p2 }
  0x29   :  { %p1066_p5 = pnand %p1065_p4, %p1059_p1 }
  0x2b   :  { %1069 = shalt.err (!%p1066_p5)
}
  0x2c   :  { %s1082_s0 = smov 64   ;;  %s1083_s24 = smov 4  }
  0x2d   :  { %62 = dma.hbm_to_vmem [thread:$0]  %s1160_s4, 4096, %s57_s22, [#allocation8], %s1082_s0, %s1082_s0, %s1083_s24  }
  0x2e   :  { %1070 = dma.done.wait [#allocation3], 256  }
  0x2f   :  { %1071 = vsyncadd [#allocation3], 4294967040 }
  0x30   :  { %1072 = dma.done.wait [#allocation5], 8256  }
  0x31   :  { %1073 = vsyncadd [#allocation5], 4294959040 }
  0x32   :  { %1074 = dma.done.wait [#allocation8], 4096  }
  0x33   :  { %1075 = vsyncadd [#allocation8], 4294963200  ;;  %v110_v0 = vld [vmem:[#allocation4 + $0xf0] sm:$0xff]  ;;  %v111_v1 = vld [vmem:[#allocation4 + $0xf8] sm:$0xff] }
  0x34   :  { %v108_v2 = vld [vmem:[#allocation4 + $0xe0] sm:$0xff]  ;;  %v205_v3 = vunpack.c.h.bf16 %v110_v0  ;;  %v207_v4 = vunpack.c.h.bf16 %v111_v1  ;;  %v204_v5 = vunpack.c.l.bf16 %v110_v0  ;;  %v206_v6 = vunpack.c.l.bf16 %v111_v1  ;;  %v109_v7 = vld [vmem:[#allocation4 + $0xe8] sm:$0xff]  ;;  %v106_v8 = vld [vmem:[#allocation4 + $0xd0] sm:$0xff] }
  0x35   :  { %v107_v9 = vld [vmem:[#allocation4 + $0xd8] sm:$0xff]  ;;  %v201_v10 = vunpack.c.h.bf16 %v108_v2  ;;  %v203_v11 = vunpack.c.h.bf16 %v109_v7  ;;  %v200_v12 = vunpack.c.l.bf16 %v108_v2  ;;  %v202_v13 = vunpack.c.l.bf16 %v109_v7  ;;  %v104_v14 = vld [vmem:[#allocation4 + $0xc0] sm:$0xff]  ;;  %v105_v15 = vld [vmem:[#allocation4 + $0xc8] sm:$0xff] }
  0x36   :  { %422 = vmatprep.subr.mxu0 %v205_v3  ;;  %493 = vmatprep.subr.mxu1 %v207_v4  ;;  %v197_v16 = vunpack.c.h.bf16 %v106_v8  ;;  %v199_v17 = vunpack.c.h.bf16 %v107_v9  ;;  %v196_v18 = vunpack.c.l.bf16 %v106_v8  ;;  %v198_v19 = vunpack.c.l.bf16 %v107_v9  ;;  %v102_v20 = vld [vmem:[#allocation4 + $0xb0] sm:$0xff]  ;;  %v103_v21 = vld [vmem:[#allocation4 + $0xb8] sm:$0xff]  ;;  %v100_v26 = vld [vmem:[#allocation4 + $0xa0] sm:$0xff] }
  0x37   :  { %423 = vmatpush1.msra.mxu0 %v204_v5  ;;  %494 = vmatpush1.msra.mxu1 %v206_v6  ;;  %v193_v22 = vunpack.c.h.bf16 %v104_v14  ;;  %v195_v23 = vunpack.c.h.bf16 %v105_v15  ;;  %v192_v24 = vunpack.c.l.bf16 %v104_v14  ;;  %v194_v25 = vunpack.c.l.bf16 %v105_v15  ;;  %v101_v27 = vld [vmem:[#allocation4 + $0xa8] sm:$0xff]  ;;  %v98_v32 = vld [vmem:[#allocation4 + $0x90] sm:$0xff]  ;;  %v99_v33 = vld [vmem:[#allocation4 + $0x98] sm:$0xff] }
  0x38   :  { %424 = vmatprep.subr.mxu0 %v201_v10  ;;  %495 = vmatprep.subr.mxu1 %v203_v11  ;;  %v189_v28 = vunpack.c.h.bf16 %v102_v20  ;;  %v191_v29 = vunpack.c.h.bf16 %v103_v21  ;;  %v188_v30 = vunpack.c.l.bf16 %v102_v20  ;;  %v190_v31 = vunpack.c.l.bf16 %v103_v21  ;;  %v96_v38 = vld [vmem:[#allocation4 + $0x80] sm:$0xff]  ;;  %v97_v39 = vld [vmem:[#allocation4 + $0x88] sm:$0xff]  ;;  %v94_v44 = vld [vmem:[#allocation4 + $0x70] sm:$0xff] }
  0x39   :  { %425 = vmatpush1.msra.mxu0 %v200_v12  ;;  %496 = vmatpush1.msra.mxu1 %v202_v13  ;;  %v185_v34 = vunpack.c.h.bf16 %v100_v26  ;;  %v187_v35 = vunpack.c.h.bf16 %v101_v27  ;;  %v184_v36 = vunpack.c.l.bf16 %v100_v26  ;;  %v186_v37 = vunpack.c.l.bf16 %v101_v27  ;;  %v95_v45 = vld [vmem:[#allocation4 + $0x78] sm:$0xff]  ;;  %v92_v50 = vld [vmem:[#allocation4 + $0x60] sm:$0xff]  ;;  %v93_v51 = vld [vmem:[#allocation4 + $0x68] sm:$0xff] }
  0x3a   :  { %426 = vmatprep.subr.mxu0 %v197_v16  ;;  %497 = vmatprep.subr.mxu1 %v199_v17  ;;  %v181_v40 = vunpack.c.h.bf16 %v98_v32  ;;  %v183_v41 = vunpack.c.h.bf16 %v99_v33  ;;  %v180_v42 = vunpack.c.l.bf16 %v98_v32  ;;  %v182_v43 = vunpack.c.l.bf16 %v99_v33  ;;  %v90_v56 = vld [vmem:[#allocation4 + $0x50] sm:$0xff]  ;;  %v91_v57 = vld [vmem:[#allocation4 + $0x58] sm:$0xff]  ;;  %v88_v62 = vld [vmem:[#allocation4 + $0x40] sm:$0xff] }
  0x3b   :  { %427 = vmatpush1.msra.mxu0 %v196_v18  ;;  %498 = vmatpush1.msra.mxu1 %v198_v19  ;;  %v177_v46 = vunpack.c.h.bf16 %v96_v38  ;;  %v179_v47 = vunpack.c.h.bf16 %v97_v39  ;;  %v176_v48 = vunpack.c.l.bf16 %v96_v38  ;;  %v178_v49 = vunpack.c.l.bf16 %v97_v39  ;;  %v89_v63 = vld [vmem:[#allocation4 + $0x48] sm:$0xff]  ;;  %v86_v4 = vld [vmem:[#allocation4 + $0x30] sm:$0xff]  ;;  %v87_v5 = vld [vmem:[#allocation4 + $0x38] sm:$0xff] }
  0x3c   :  { %428 = vmatprep.subr.mxu0 %v193_v22  ;;  %499 = vmatprep.subr.mxu1 %v195_v23  ;;  %v173_v52 = vunpack.c.h.bf16 %v94_v44  ;;  %v175_v53 = vunpack.c.h.bf16 %v95_v45  ;;  %v172_v54 = vunpack.c.l.bf16 %v94_v44  ;;  %v174_v55 = vunpack.c.l.bf16 %v95_v45  ;;  %v84_v10 = vld [vmem:[#allocation4 + $0x20] sm:$0xff]  ;;  %v85_v11 = vld [vmem:[#allocation4 + $0x28] sm:$0xff]  ;;  %v82_v16 = vld [vmem:[#allocation4 + $0x10] sm:$0xff] }
  0x3d   :  { %429 = vmatpush1.msra.mxu0 %v192_v24  ;;  %500 = vmatpush1.msra.mxu1 %v194_v25  ;;  %v169_v58 = vunpack.c.h.bf16 %v92_v50  ;;  %v171_v59 = vunpack.c.h.bf16 %v93_v51  ;;  %v168_v60 = vunpack.c.l.bf16 %v92_v50  ;;  %v170_v61 = vunpack.c.l.bf16 %v93_v51  ;;  %v83_v17 = vld [vmem:[#allocation4 + $0x18] sm:$0xff]  ;;  %v80_v22 = vld [vmem:[#allocation4] sm:$0xff]  ;;  %v81_v23 = vld [vmem:[#allocation4 + $0x8] sm:$0xff] }
  0x3e   :  { %430 = vmatprep.subr.mxu0 %v189_v28  ;;  %501 = vmatprep.subr.mxu1 %v191_v29  ;;  %v165_v0 = vunpack.c.h.bf16 %v90_v56  ;;  %v167_v1 = vunpack.c.h.bf16 %v91_v57  ;;  %v164_v2 = vunpack.c.l.bf16 %v90_v56  ;;  %v166_v3 = vunpack.c.l.bf16 %v91_v57  ;;  %v142_v28 = vld [vmem:[#allocation4 + $0x1f0] sm:$0xff]  ;;  %v143_v29 = vld [vmem:[#allocation4 + $0x1f8] sm:$0xff] }
  0x3f   :  { %431 = vmatpush1.msra.mxu0 %v188_v30  ;;  %502 = vmatpush1.msra.mxu1 %v190_v31  ;;  %v161_v6 = vunpack.c.h.bf16 %v88_v62  ;;  %v163_v7 = vunpack.c.h.bf16 %v89_v63  ;;  %v160_v8 = vunpack.c.l.bf16 %v88_v62  ;;  %v162_v9 = vunpack.c.l.bf16 %v89_v63 }
  0x40   :  { %432 = vmatprep.subr.mxu0 %v185_v34  ;;  %503 = vmatprep.subr.mxu1 %v187_v35  ;;  %v157_v12 = vunpack.c.h.bf16 %v86_v4  ;;  %v159_v13 = vunpack.c.h.bf16 %v87_v5  ;;  %v156_v14 = vunpack.c.l.bf16 %v86_v4  ;;  %v158_v15 = vunpack.c.l.bf16 %v87_v5  ;;  %v140_v34 = vld [vmem:[#allocation4 + $0x1e0] sm:$0xff]  ;;  %v141_v35 = vld [vmem:[#allocation4 + $0x1e8] sm:$0xff] }
  0x41   :  { %433 = vmatpush1.msra.mxu0 %v184_v36  ;;  %504 = vmatpush1.msra.mxu1 %v186_v37  ;;  %v153_v18 = vunpack.c.h.bf16 %v84_v10  ;;  %v155_v19 = vunpack.c.h.bf16 %v85_v11  ;;  %v152_v20 = vunpack.c.l.bf16 %v84_v10  ;;  %v154_v21 = vunpack.c.l.bf16 %v85_v11 }
  0x42   :  { %434 = vmatprep.subr.mxu0 %v181_v40  ;;  %505 = vmatprep.subr.mxu1 %v183_v41  ;;  %v149_v24 = vunpack.c.h.bf16 %v82_v16  ;;  %v151_v25 = vunpack.c.h.bf16 %v83_v17  ;;  %v148_v26 = vunpack.c.l.bf16 %v82_v16  ;;  %v150_v27 = vunpack.c.l.bf16 %v83_v17  ;;  %v138_v40 = vld [vmem:[#allocation4 + $0x1d0] sm:$0xff]  ;;  %v139_v41 = vld [vmem:[#allocation4 + $0x1d8] sm:$0xff] }
  0x43   :  { %435 = vmatpush1.msra.mxu0 %v180_v42  ;;  %506 = vmatpush1.msra.mxu1 %v182_v43  ;;  %v145_v30 = vunpack.c.h.bf16 %v80_v22  ;;  %v147_v31 = vunpack.c.h.bf16 %v81_v23  ;;  %v144_v32 = vunpack.c.l.bf16 %v80_v22  ;;  %v146_v33 = vunpack.c.l.bf16 %v81_v23 }
  0x44   :  { %436 = vmatprep.subr.mxu0 %v177_v46  ;;  %507 = vmatprep.subr.mxu1 %v179_v47  ;;  %v269_v36 = vunpack.c.h.bf16 %v142_v28  ;;  %v271_v37 = vunpack.c.h.bf16 %v143_v29  ;;  %v268_v38 = vunpack.c.l.bf16 %v142_v28  ;;  %v270_v39 = vunpack.c.l.bf16 %v143_v29  ;;  %v136_v46 = vld [vmem:[#allocation4 + $0x1c0] sm:$0xff]  ;;  %v137_v47 = vld [vmem:[#allocation4 + $0x1c8] sm:$0xff] }
  0x45   :  { %437 = vmatpush1.msra.mxu0 %v176_v48  ;;  %508 = vmatpush1.msra.mxu1 %v178_v49  ;;  %v265_v42 = vunpack.c.h.bf16 %v140_v34  ;;  %v267_v43 = vunpack.c.h.bf16 %v141_v35  ;;  %v264_v44 = vunpack.c.l.bf16 %v140_v34  ;;  %v266_v45 = vunpack.c.l.bf16 %v141_v35 }
  0x46   :  { %438 = vmatprep.subr.mxu0 %v173_v52  ;;  %509 = vmatprep.subr.mxu1 %v175_v53  ;;  %v261_v48 = vunpack.c.h.bf16 %v138_v40  ;;  %v263_v49 = vunpack.c.h.bf16 %v139_v41  ;;  %v260_v50 = vunpack.c.l.bf16 %v138_v40  ;;  %v262_v51 = vunpack.c.l.bf16 %v139_v41  ;;  %v134_v52 = vld [vmem:[#allocation4 + $0x1b0] sm:$0xff]  ;;  %v135_v53 = vld [vmem:[#allocation4 + $0x1b8] sm:$0xff] }
  0x47   :  { %439 = vmatpush1.msra.mxu0 %v172_v54  ;;  %510 = vmatpush1.msra.mxu1 %v174_v55  ;;  %v257_v54 = vunpack.c.h.bf16 %v136_v46  ;;  %v259_v55 = vunpack.c.h.bf16 %v137_v47  ;;  %v256_v56 = vunpack.c.l.bf16 %v136_v46  ;;  %v258_v57 = vunpack.c.l.bf16 %v137_v47 }
  0x48   :  { %440 = vmatprep.subr.mxu0 %v169_v58  ;;  %511 = vmatprep.subr.mxu1 %v171_v59  ;;  %v132_v58 = vld [vmem:[#allocation4 + $0x1a0] sm:$0xff]  ;;  %v133_v59 = vld [vmem:[#allocation4 + $0x1a8] sm:$0xff]  ;;  %v252_v62 = vunpack.c.l.bf16 %v134_v52  ;;  %v254_v63 = vunpack.c.l.bf16 %v135_v53 }
  0x49   :  { %441 = vmatpush1.msra.mxu0 %v168_v60  ;;  %512 = vmatpush1.msra.mxu1 %v170_v61  ;;  %v253_v60 = vunpack.c.h.bf16 %v134_v52  ;;  %v255_v61 = vunpack.c.h.bf16 %v135_v53  ;;  %v248_v4 = vunpack.c.l.bf16 %v132_v58  ;;  %v250_v5 = vunpack.c.l.bf16 %v133_v59 }
  0x4a   :  { %442 = vmatprep.subr.mxu0 %v165_v0  ;;  %513 = vmatprep.subr.mxu1 %v167_v1  ;;  %v130_v0 = vld [vmem:[#allocation4 + $0x190] sm:$0xff]  ;;  %v131_v1 = vld [vmem:[#allocation4 + $0x198] sm:$0xff] }
  0x4b   :  { %443 = vmatpush1.msra.mxu0 %v164_v2  ;;  %514 = vmatpush1.msra.mxu1 %v166_v3  ;;  %v249_v2 = vunpack.c.h.bf16 %v132_v58  ;;  %v251_v3 = vunpack.c.h.bf16 %v133_v59  ;;  %v244_v10 = vunpack.c.l.bf16 %v130_v0  ;;  %v246_v11 = vunpack.c.l.bf16 %v131_v1 }
  0x4c   :  { %444 = vmatprep.subr.mxu0 %v161_v6  ;;  %515 = vmatprep.subr.mxu1 %v163_v7  ;;  %v128_v6 = vld [vmem:[#allocation4 + $0x180] sm:$0xff]  ;;  %v129_v7 = vld [vmem:[#allocation4 + $0x188] sm:$0xff] }
  0x4d   :  { %445 = vmatpush1.msra.mxu0 %v160_v8  ;;  %516 = vmatpush1.msra.mxu1 %v162_v9  ;;  %v245_v8 = vunpack.c.h.bf16 %v130_v0  ;;  %v247_v9 = vunpack.c.h.bf16 %v131_v1  ;;  %v240_v16 = vunpack.c.l.bf16 %v128_v6  ;;  %v242_v17 = vunpack.c.l.bf16 %v129_v7  ;;  %v911_v0 = vld [vmem:[#allocation7 + $0xf8] sm:$0xff]  }
  0x4e   :  { %446 = vmatprep.subr.mxu0 %v157_v12  ;;  %517 = vmatprep.subr.mxu1 %v159_v13  ;;  %v126_v12 = vld [vmem:[#allocation4 + $0x170] sm:$0xff]  ;;  %v127_v13 = vld [vmem:[#allocation4 + $0x178] sm:$0xff] }
  0x4f   :  { %447 = vmatpush1.msra.mxu0 %v156_v14  ;;  %518 = vmatpush1.msra.mxu1 %v158_v15  ;;  %v241_v14 = vunpack.c.h.bf16 %v128_v6  ;;  %v243_v15 = vunpack.c.h.bf16 %v129_v7  ;;  %v236_v22 = vunpack.c.l.bf16 %v126_v12  ;;  %v238_v23 = vunpack.c.l.bf16 %v127_v13  ;;  %v78_v1 = vld [vmem:[#allocation2 + $0x8] sm:$0xff] }
  0x50   :  { %448 = vmatprep.subr.mxu0 %v153_v18  ;;  %519 = vmatprep.subr.mxu1 %v155_v19  ;;  %v124_v18 = vld [vmem:[#allocation4 + $0x160] sm:$0xff]  ;;  %v125_v19 = vld [vmem:[#allocation4 + $0x168] sm:$0xff]  ;;  %v880_v7 = vunpack.c.h.bf16 %v911_v0 }
  0x51   :  { %449 = vmatpush1.msra.mxu0 %v152_v20  ;;  %520 = vmatpush1.msra.mxu1 %v154_v21  ;;  %v237_v20 = vunpack.c.h.bf16 %v126_v12  ;;  %v239_v21 = vunpack.c.h.bf16 %v127_v13  ;;  %v232_v28 = vunpack.c.l.bf16 %v124_v18  ;;  %v234_v29 = vunpack.c.l.bf16 %v125_v19 }
  0x52   :  { %450 = vmatprep.subr.mxu0 %v149_v24  ;;  %521 = vmatprep.subr.mxu1 %v151_v25  ;;  %v122_v24 = vld [vmem:[#allocation4 + $0x150] sm:$0xff]  ;;  %v123_v25 = vld [vmem:[#allocation4 + $0x158] sm:$0xff]  ;;  %v879_v13 = vunpack.c.l.bf16 %v911_v0 }
  0x53   :  { %451 = vmatpush1.msra.mxu0 %v148_v26  ;;  %522 = vmatpush1.msra.mxu1 %v150_v27  ;;  %v233_v26 = vunpack.c.h.bf16 %v124_v18  ;;  %v235_v27 = vunpack.c.h.bf16 %v125_v19  ;;  %v228_v34 = vunpack.c.l.bf16 %v122_v24  ;;  %v230_v35 = vunpack.c.l.bf16 %v123_v25 }
  0x54   :  { %452 = vmatprep.subr.mxu0 %v145_v30  ;;  %523 = vmatprep.subr.mxu1 %v147_v31  ;;  %v120_v30 = vld [vmem:[#allocation4 + $0x140] sm:$0xff]  ;;  %v121_v31 = vld [vmem:[#allocation4 + $0x148] sm:$0xff] }
  0x55   :  { %453 = vmatpush1.msra.mxu0 %v144_v32  ;;  %524 = vmatpush1.msra.mxu1 %v146_v33  ;;  %v229_v32 = vunpack.c.h.bf16 %v122_v24  ;;  %v231_v33 = vunpack.c.h.bf16 %v123_v25  ;;  %v224_v40 = vunpack.c.l.bf16 %v120_v30  ;;  %v226_v41 = vunpack.c.l.bf16 %v121_v31 }
  0x56   :  { %454 = vmatprep.subr.mxu0 %v269_v36  ;;  %525 = vmatprep.subr.mxu1 %v271_v37  ;;  %v118_v36 = vld [vmem:[#allocation4 + $0x130] sm:$0xff]  ;;  %v119_v37 = vld [vmem:[#allocation4 + $0x138] sm:$0xff] }
  0x57   :  { %455 = vmatpush2.msra.mxu0 %v268_v38  ;;  %526 = vmatpush2.msra.mxu1 %v270_v39  ;;  %v225_v38 = vunpack.c.h.bf16 %v120_v30  ;;  %v227_v39 = vunpack.c.h.bf16 %v121_v31  ;;  %v220_v46 = vunpack.c.l.bf16 %v118_v36  ;;  %v222_v47 = vunpack.c.l.bf16 %v119_v37 }
  0x58   :  { %456 = vmatprep.subr.mxu0 %v265_v42  ;;  %527 = vmatprep.subr.mxu1 %v267_v43  ;;  %v116_v42 = vld [vmem:[#allocation4 + $0x120] sm:$0xff]  ;;  %v117_v43 = vld [vmem:[#allocation4 + $0x128] sm:$0xff] }
  0x59   :  { %457 = vmatpush2.msra.mxu0 %v264_v44  ;;  %528 = vmatpush2.msra.mxu1 %v266_v45  ;;  %v221_v44 = vunpack.c.h.bf16 %v118_v36  ;;  %v223_v45 = vunpack.c.h.bf16 %v119_v37  ;;  %v216_v52 = vunpack.c.l.bf16 %v116_v42  ;;  %v218_v53 = vunpack.c.l.bf16 %v117_v43 }
  0x5a   :  { %458 = vmatprep.subr.mxu0 %v261_v48  ;;  %529 = vmatprep.subr.mxu1 %v263_v49  ;;  %v114_v48 = vld [vmem:[#allocation4 + $0x110] sm:$0xff]  ;;  %v115_v49 = vld [vmem:[#allocation4 + $0x118] sm:$0xff] }
  0x5b   :  { %459 = vmatpush2.msra.mxu0 %v260_v50  ;;  %530 = vmatpush2.msra.mxu1 %v262_v51  ;;  %v217_v50 = vunpack.c.h.bf16 %v116_v42  ;;  %v219_v51 = vunpack.c.h.bf16 %v117_v43  ;;  %v212_v58 = vunpack.c.l.bf16 %v114_v48  ;;  %v214_v59 = vunpack.c.l.bf16 %v115_v49 }
  0x5c   :  { %460 = vmatprep.subr.mxu0 %v257_v54  ;;  %531 = vmatprep.subr.mxu1 %v259_v55  ;;  %v112_v54 = vld [vmem:[#allocation4 + $0x100] sm:$0xff]  ;;  %v113_v55 = vld [vmem:[#allocation4 + $0x108] sm:$0xff] }
  0x5d   :  { %461 = vmatpush2.msra.mxu0 %v256_v56  ;;  %532 = vmatpush2.msra.mxu1 %v258_v57  ;;  %v213_v56 = vunpack.c.h.bf16 %v114_v48  ;;  %v215_v57 = vunpack.c.h.bf16 %v115_v49 }
  0x5e   :  { %462 = vmatprep.subr.mxu0 %v253_v60  ;;  %533 = vmatprep.subr.mxu1 %v255_v61  ;;  %v209_v60 = vunpack.c.h.bf16 %v112_v54  ;;  %v211_v61 = vunpack.c.h.bf16 %v113_v55 }
  0x5f   :  { %463 = vmatpush2.msra.mxu0 %v252_v62  ;;  %534 = vmatpush2.msra.mxu1 %v254_v63  ;;  %v208_v62 = vunpack.c.l.bf16 %v112_v54  ;;  %v895_v63 = vld [vmem:[#allocation7 + $0x78] sm:$0xff]  }
  0x60   :  { %464 = vmatprep.subr.mxu0 %v249_v2  ;;  %535 = vmatprep.subr.mxu1 %v251_v3  ;;  %v210_v2 = vunpack.c.l.bf16 %v113_v55  ;;  %v887_v3 = vld [vmem:[#allocation7 + $0x38] sm:$0xff]   ;;  %v816_v6 = vunpack.c.h.bf16 %v895_v63  ;;  %v815_v12 = vunpack.c.l.bf16 %v895_v63  ;;  %v898_v63 = vld [vmem:[#allocation7 + $0x90] sm:$0xff]  }
  0x61   :  { %465 = vmatpush2.msra.mxu0 %v248_v4  ;;  %536 = vmatpush2.msra.mxu1 %v250_v5  ;;  %v903_v4 = vld [vmem:[#allocation7 + $0xb8] sm:$0xff]   ;;  %v77_v5 = vld [vmem:[#allocation2] sm:$0xff] }
  0x62   :  { %466 = vmatprep.subr.mxu0 %v245_v8  ;;  %537 = vmatprep.subr.mxu1 %v247_v9  ;;  %v784_v8 = vunpack.c.h.bf16 %v887_v3  ;;  %v848_v9 = vunpack.c.h.bf16 %v903_v4 }
  0x63   :  { %467 = vmatpush2.msra.mxu0 %v244_v10  ;;  %538 = vmatpush2.msra.mxu1 %v246_v11  ;;  %v894_v10 = vld [vmem:[#allocation7 + $0x70] sm:$0xff]  }
  0x64   :  { %468 = vmatprep.subr.mxu0 %v241_v14  ;;  %539 = vmatprep.subr.mxu1 %v243_v15  ;;  %v910_v11 = vld [vmem:[#allocation7 + $0xf0] sm:$0xff]   ;;  %v812_v18 = vunpack.c.h.bf16 %v894_v10  ;;  %v811_v24 = vunpack.c.l.bf16 %v894_v10  ;;  %v889_v10 = vld [vmem:[#allocation7 + $0x48] sm:$0xff]  }
  0x65   :  { %469 = vmatpush2.msra.mxu0 %v240_v16  ;;  %540 = vmatpush2.msra.mxu1 %v242_v17  ;;  %v886_v14 = vld [vmem:[#allocation7 + $0x30] sm:$0xff]   ;;  %v783_v16 = vunpack.c.l.bf16 %v887_v3  ;;  %v847_v17 = vunpack.c.l.bf16 %v903_v4  ;;  %v876_v19 = vunpack.c.h.bf16 %v910_v11  ;;  %v875_v25 = vunpack.c.l.bf16 %v910_v11  ;;  %v905_v11 = vld [vmem:[#allocation7 + $0xc8] sm:$0xff]  }
  0x66   :  { %470 = vmatprep.subr.mxu0 %v237_v20  ;;  %541 = vmatprep.subr.mxu1 %v239_v21  ;;  %v902_v15 = vld [vmem:[#allocation7 + $0xb0] sm:$0xff]   ;;  %v780_v20 = vunpack.c.h.bf16 %v886_v14 }
  0x67   :  { %471 = vmatpush2.msra.mxu0 %v236_v22  ;;  %542 = vmatpush2.msra.mxu1 %v238_v23  ;;  %v844_v21 = vunpack.c.h.bf16 %v902_v15  ;;  %v893_v22 = vld [vmem:[#allocation7 + $0x68] sm:$0xff]  }
  0x68   :  { %472 = vmatprep.subr.mxu0 %v233_v26  ;;  %543 = vmatprep.subr.mxu1 %v235_v27  ;;  %v909_v23 = vld [vmem:[#allocation7 + $0xe8] sm:$0xff]   ;;  %v808_v30 = vunpack.c.h.bf16 %v893_v22  ;;  %v807_v36 = vunpack.c.l.bf16 %v893_v22  ;;  %v888_v22 = vld [vmem:[#allocation7 + $0x40] sm:$0xff]  }
  0x69   :  { %473 = vmatpush2.msra.mxu0 %v232_v28  ;;  %544 = vmatpush2.msra.mxu1 %v234_v29  ;;  %v885_v26 = vld [vmem:[#allocation7 + $0x28] sm:$0xff]   ;;  %v779_v28 = vunpack.c.l.bf16 %v886_v14  ;;  %v843_v29 = vunpack.c.l.bf16 %v902_v15  ;;  %v872_v31 = vunpack.c.h.bf16 %v909_v23  ;;  %v871_v37 = vunpack.c.l.bf16 %v909_v23  ;;  %v904_v23 = vld [vmem:[#allocation7 + $0xc0] sm:$0xff]  }
  0x6a   :  { %474 = vmatprep.subr.mxu0 %v229_v32  ;;  %545 = vmatprep.subr.mxu1 %v231_v33  ;;  %v901_v27 = vld [vmem:[#allocation7 + $0xa8] sm:$0xff]   ;;  %v776_v32 = vunpack.c.h.bf16 %v885_v26 }
  0x6b   :  { %475 = vmatpush2.msra.mxu0 %v228_v34  ;;  %546 = vmatpush2.msra.mxu1 %v230_v35  ;;  %v840_v33 = vunpack.c.h.bf16 %v901_v27  ;;  %v892_v34 = vld [vmem:[#allocation7 + $0x60] sm:$0xff]   ;;  %v881_v14 = vld [vmem:[#allocation7 + $0x8] sm:$0xff]  }
  0x6c   :  { %476 = vmatprep.subr.mxu0 %v225_v38  ;;  %547 = vmatprep.subr.mxu1 %v227_v39  ;;  %v908_v35 = vld [vmem:[#allocation7 + $0xe0] sm:$0xff]   ;;  %v804_v42 = vunpack.c.h.bf16 %v892_v34  ;;  %v803_v48 = vunpack.c.l.bf16 %v892_v34  ;;  %v897_v15 = vld [vmem:[#allocation7 + $0x88] sm:$0xff]   ;;  %v402_v34 = vlaneseq }
  0x6d   :  { %477 = vmatpush2.msra.mxu0 %v224_v40  ;;  %548 = vmatpush2.msra.mxu1 %v226_v41  ;;  %v884_v38 = vld [vmem:[#allocation7 + $0x20] sm:$0xff]   ;;  %v775_v40 = vunpack.c.l.bf16 %v885_v26  ;;  %v839_v41 = vunpack.c.l.bf16 %v901_v27  ;;  %v868_v43 = vunpack.c.h.bf16 %v908_v35  ;;  %v867_v49 = vunpack.c.l.bf16 %v908_v35 }
  0x6e   :  { %478 = vmatprep.subr.mxu0 %v221_v44  ;;  %549 = vmatprep.subr.mxu1 %v223_v45  ;;  %v900_v39 = vld [vmem:[#allocation7 + $0xa0] sm:$0xff]   ;;  %v772_v44 = vunpack.c.h.bf16 %v884_v38  ;;  %v403_v35 = vshrl.u32 %v402_v34, 7 }
  0x6f   :  { %479 = vmatpush2.msra.mxu0 %v220_v46  ;;  %550 = vmatpush2.msra.mxu1 %v222_v47  ;;  %v836_v45 = vunpack.c.h.bf16 %v900_v39  ;;  %v891_v46 = vld [vmem:[#allocation7 + $0x58] sm:$0xff]   ;;  %v754_v26 = vld [vmem:[#allocation7] sm:$0xff]  }
  0x70   :  { %480 = vmatprep.subr.mxu0 %v217_v50  ;;  %551 = vmatprep.subr.mxu1 %v219_v51  ;;  %v907_v47 = vld [vmem:[#allocation7 + $0xd8] sm:$0xff]   ;;  %v800_v54 = vunpack.c.h.bf16 %v891_v46  ;;  %v896_v27 = vld [vmem:[#allocation7 + $0x80] sm:$0xff]  }
  0x71   :  { %481 = vmatpush2.msra.mxu0 %v216_v52  ;;  %552 = vmatpush2.msra.mxu1 %v218_v53  ;;  %v883_v50 = vld [vmem:[#allocation7 + $0x18] sm:$0xff]   ;;  %v771_v52 = vunpack.c.l.bf16 %v884_v38  ;;  %v835_v53 = vunpack.c.l.bf16 %v900_v39  ;;  %v864_v55 = vunpack.c.h.bf16 %v907_v47  ;;  %v408_v39 = vsub.s32 1, %v403_v35 }
  0x72   :  { %482 = vmatprep.subr.mxu0 %v213_v56  ;;  %553 = vmatprep.subr.mxu1 %v215_v57  ;;  %v899_v51 = vld [vmem:[#allocation7 + $0x98] sm:$0xff]   ;;  %v768_v56 = vunpack.c.h.bf16 %v883_v50  ;;  %v767_v0 = vunpack.c.l.bf16 %v883_v50 }
  0x73   :  { %483 = vmatpush2.msra.mxu0 %v212_v58  ;;  %554 = vmatpush2.msra.mxu1 %v214_v59  ;;  %v832_v57 = vunpack.c.h.bf16 %v899_v51  ;;  %v890_v58 = vld [vmem:[#allocation7 + $0x50] sm:$0xff]   ;;  %v400_v38 = vld [vmem:[#allocation6] sm:$0xf] }
  0x74   :  { %484 = vmatprep.subr.mxu0 %v209_v60  ;;  %555 = vmatprep.subr.mxu1 %v211_v61  ;;  %v906_v59 = vld [vmem:[#allocation7 + $0xd0] sm:$0xff]   ;;  %v799_v60 = vunpack.c.l.bf16 %v891_v46  ;;  %v863_v61 = vunpack.c.l.bf16 %v907_v47 }
  0x75   :  { %485 = vmatpush2.msra.mxu0 %v208_v62  ;;  %486 = vmatprep.mubr.f32.mxu0 %v78_v1  ;;  %v882_v62 = vld [vmem:[#allocation7 + $0x10] sm:$0xff]   ;;  %v860_v3 = vunpack.c.h.bf16 %v906_v59 }
  0x76   :  { %556 = vmatpush2.msra.mxu1 %v210_v2  ;;  %557 = vmatprep.mubr.f32.mxu1 %v78_v1  ;;  %v831_v1 = vunpack.c.l.bf16 %v899_v51  ;;  %v796_v2 = vunpack.c.h.bf16 %v890_v58  ;;  %v764_v4 = vunpack.c.h.bf16 %v882_v62 }
  0x77   :  { %487 = vmatmul.mubr.f32.vlgmr.msra.gmra.mxu0 %v77_v5  ;;  %558 = vmatmul.mubr.f32.vlgmr.msra.gmra.mxu1 %v77_v5  ;;  %v828_v5 = vunpack.c.h.bf16 %v898_v63 }
  0x78   :  { %912 = vmatprep.subr.mxu0 %v816_v6  ;;  %947 = vmatprep.subr.mxu1 %v880_v7  ;;  %v795_v6 = vunpack.c.l.bf16 %v890_v58  ;;  %v859_v7 = vunpack.c.l.bf16 %v906_v59 }
  0x79   :  { %913 = vmatpush3.msra.mxu0 %v784_v8  ;;  %948 = vmatpush3.msra.mxu1 %v848_v9  ;;  %v763_v8 = vunpack.c.l.bf16 %v882_v62  ;;  %v827_v9 = vunpack.c.l.bf16 %v898_v63 }
  0x7a   :  { %914 = vmatprep.subr.mxu0 %v815_v12  ;;  %949 = vmatprep.subr.mxu1 %v879_v13  ;;  %v792_v12 = vunpack.c.h.bf16 %v889_v10  ;;  %v856_v13 = vunpack.c.h.bf16 %v905_v11 }
  0x7b   :  { %915 = vmatpush3.msra.mxu0 %v783_v16  ;;  %950 = vmatpush3.msra.mxu1 %v847_v17  ;;  %v760_v16 = vunpack.c.h.bf16 %v881_v14  ;;  %v824_v17 = vunpack.c.h.bf16 %v897_v15 }
  0x7c   :  { %916 = vmatprep.subr.mxu0 %v812_v18  ;;  %951 = vmatprep.subr.mxu1 %v876_v19  ;;  %v791_v18 = vunpack.c.l.bf16 %v889_v10  ;;  %v855_v19 = vunpack.c.l.bf16 %v905_v11 }
  0x7d   :  { %917 = vmatpush3.msra.mxu0 %v780_v20  ;;  %952 = vmatpush3.msra.mxu1 %v844_v21  ;;  %v759_v20 = vunpack.c.l.bf16 %v881_v14  ;;  %v823_v21 = vunpack.c.l.bf16 %v897_v15 }
  0x7e   :  { %918 = vmatprep.subr.mxu0 %v811_v24  ;;  %953 = vmatprep.subr.mxu1 %v875_v25  ;;  %v788_v24 = vunpack.c.h.bf16 %v888_v22  ;;  %v852_v25 = vunpack.c.h.bf16 %v904_v23 }
  0x7f   :  { %919 = vmatpush3.msra.mxu0 %v779_v28  ;;  %954 = vmatpush3.msra.mxu1 %v843_v29  ;;  %v756_v28 = vunpack.c.h.bf16 %v754_v26  ;;  %v820_v29 = vunpack.c.h.bf16 %v896_v27 }
  0x80   :  { %920 = vmatprep.subr.mxu0 %v808_v30  ;;  %955 = vmatprep.subr.mxu1 %v872_v31  ;;  %v787_v30 = vunpack.c.l.bf16 %v888_v22  ;;  %v851_v31 = vunpack.c.l.bf16 %v904_v23 }
  0x81   :  { %921 = vmatpush3.msra.mxu0 %v776_v32  ;;  %956 = vmatpush3.msra.mxu1 %v840_v33  ;;  %v755_v32 = vunpack.c.l.bf16 %v754_v26  ;;  %v819_v33 = vunpack.c.l.bf16 %v896_v27 }
  0x82   :  { %922 = vmatprep.subr.mxu0 %v807_v36  ;;  %957 = vmatprep.subr.mxu1 %v871_v37  ;;  %v412_v36 = vsub.s32 2, %v403_v35  ;;  %v404_v37 = vsub.s32 0, %v403_v35 }
  0x83   :  { %923 = vmatpush3.msra.mxu0 %v775_v40  ;;  %958 = vmatpush3.msra.mxu1 %v839_v41  ;;  %v416_v40 = vsub.s32 3, %v403_v35 }
  0x84   :  { %924 = vmatprep.subr.mxu0 %v804_v42  ;;  %959 = vmatprep.subr.mxu1 %v868_v43  ;;  %v413_v41 = vrot.slane %v400_v38, %v412_v36  ;;  %v405_v42 = vrot.slane %v400_v38, %v404_v37  ;;  %v409_v43 = vrot.slane %v400_v38, %v408_v39 }
  0x85   :  { %925 = vmatpush3.msra.mxu0 %v772_v44  ;;  %960 = vmatpush3.msra.mxu1 %v836_v45  ;;  %v417_v44 = vrot.slane %v400_v38, %v416_v40 }
  0x86   :  { %926 = vmatprep.subr.mxu0 %v803_v48  ;;  %961 = vmatprep.subr.mxu1 %v867_v49 }
  0x87   :  { %927 = vmatpush3.msra.mxu0 %v771_v52  ;;  %962 = vmatpush3.msra.mxu1 %v835_v53 }
  0x88   :  { %928 = vmatprep.subr.mxu0 %v800_v54  ;;  %963 = vmatprep.subr.mxu1 %v864_v55 }
  0x89   :  { %929 = vmatpush3.msra.mxu0 %v768_v56  ;;  %964 = vmatpush3.msra.mxu1 %v832_v57  ;;  %v79_v57 = vld [vmem:[%s1157_s1] sm:$0xff] }
  0x8a   :  { %930 = vmatprep.subr.mxu0 %v799_v60  ;;  %965 = vmatprep.subr.mxu1 %v863_v61  ;;  %v730_v58 = vrot.slane %v79_v57, 4 }
  0x8b   :  { %931 = vmatpush3.msra.mxu0 %v767_v0  ;;  %966 = vmatpush3.msra.mxu1 %v831_v1 }
  0x8c   :  { %932 = vmatprep.subr.mxu0 %v796_v2  ;;  %967 = vmatprep.subr.mxu1 %v860_v3  ;;  %v731_v59 = vadd.f32 %v730_v58, %v79_v57  ;;  %v752_v2 = vld [vmem:[%s1161_s5] ss:$0 sm:$0xff] }
  0x8d   :  { %933 = vmatpush3.msra.mxu0 %v764_v4  ;;  %968 = vmatpush3.msra.mxu1 %v828_v5 }
  0x8e   :  { %934 = vmatprep.subr.mxu0 %v795_v6  ;;  %969 = vmatprep.subr.mxu1 %v859_v7  ;;  %v732_v60 = vrot.slane %v731_v59, 2 }
  0x8f   :  { %935 = vmatpush3.msra.mxu0 %v763_v8  ;;  %970 = vmatpush3.msra.mxu1 %v827_v9 }
  0x90   :  { %936 = vmatprep.subr.mxu0 %v792_v12  ;;  %971 = vmatprep.subr.mxu1 %v856_v13  ;;  %v733_v61 = vadd.f32 %v732_v60, %v731_v59 }
  0x91   :  { %937 = vmatpush3.msra.mxu0 %v760_v16  ;;  %972 = vmatpush3.msra.mxu1 %v824_v17 }
  0x92   :  { %938 = vmatprep.subr.mxu0 %v791_v18  ;;  %973 = vmatprep.subr.mxu1 %v855_v19  ;;  %v734_v62 = vrot.slane %v733_v61, 1 }
  0x93   :  { %939 = vmatpush3.msra.mxu0 %v759_v20  ;;  %974 = vmatpush3.msra.mxu1 %v823_v21 }
  0x94   :  { %940 = vmatprep.subr.mxu0 %v788_v24  ;;  %975 = vmatprep.subr.mxu1 %v852_v25  ;;  %v735_v63 = vadd.f32 %v734_v62, %v733_v61 }
  0x95   :  { %941 = vmatpush3.msra.mxu0 %v756_v28  ;;  %976 = vmatpush3.msra.mxu1 %v820_v29 }
  0x96   :  { %942 = vmatprep.subr.mxu0 %v787_v30  ;;  %977 = vmatprep.subr.mxu1 %v851_v31  ;;  %736 = vst [vmem:[%s1164_s8] sm:$0x1] %v735_v63 }
  0x97   :  { %943 = vmatpush3.msra.mxu0 %v755_v32  ;;  %978 = vmatpush3.msra.mxu1 %v819_v33 }
 0x137   :  { %v488_v45 = vpop.f32.mrf.mxu0  ;;  %v559_v46 = vpop.f32.mrf.mxu1 }
 0x138   :  { %v560_v47 = vadd.f32 %v559_v46, %v413_v41  ;;  %v489_v48 = vadd.f32 %v488_v45, %v405_v42 }
 0x139   :  { %v490_v49 = vpop.f32.mrf.mxu0  ;;  %v561_v50 = vpop.f32.mrf.mxu1 }
 0x13a   :  { %v491_v51 = vadd.f32 %v490_v49, %v409_v43  ;;  %v562_v52 = vadd.f32 %v561_v50, %v417_v44  ;;  %v566_v53 = vmax.f32 %v560_v47, 0.0  ;;  %v564_v56 = vmax.f32 %v489_v48, 0.0 }
 0x13c   :  { %v565_v54 = vmax.f32 %v491_v51, 0.0  ;;  %v567_v55 = vmax.f32 %v562_v52, 0.0 }
 0x13e   :  { %639 = vmatprep.mubr.f32.mxu0 %v565_v54  ;;  %709 = vmatprep.mubr.f32.mxu1 %v567_v55 }
 0x13f   :  { %640 = vmatmul.mubr.f32.vlgmr.msra.gmra.mxu0 %v564_v56  ;;  %710 = vmatmul.mubr.f32.vlgmr.msra.gmra.mxu1 %v566_v53 }
 0x1ff   :  { %v944_v0 = vpop.f32.mrf.mxu0  ;;  %v979_v1 = vpop.f32.mrf.mxu1 }
 0x201   :  { %v945_v3 = vpop.f32.mrf.mxu0  ;;  %v980_v4 = vpop.f32.mrf.mxu1 }
 0x202   :  { %v946_v5 = vadd.f32 %v945_v3, %v944_v0  ;;  %v981_v7 = vadd.f32 %v980_v4, %v979_v1 }
 0x204   :  { %v642_v6 = vadd.f32 %v946_v5, %v752_v2 }
 0x206   :  { %v712_v8 = vadd.f32 %v981_v7, %v642_v6 }
 0x208   :  { %v715_v9 = vmul.f32 %v712_v8, %v79_v57  ;;  %v723_v10 = vrot.slane %v712_v8, 4 }
 0x20a   :  { %v716_v11 = vrot.slane %v715_v9, 4  ;;  %v724_v12 = vadd.f32 %v723_v10, %v712_v8 }
 0x20c   :  { %v717_v13 = vadd.f32 %v716_v11, %v715_v9  ;;  %v725_v14 = vrot.slane %v724_v12, 2 }
 0x20e   :  { %v718_v15 = vrot.slane %v717_v13, 2  ;;  %v726_v16 = vadd.f32 %v725_v14, %v724_v12 }
 0x210   :  { %v719_v17 = vadd.f32 %v718_v15, %v717_v13  ;;  %v727_v18 = vrot.slane %v726_v16, 1 }
 0x212   :  { %v720_v19 = vrot.slane %v719_v17, 1  ;;  %v728_v20 = vadd.f32 %v727_v18, %v726_v16 }
 0x214   :  { %v721_v21 = vadd.f32 %v720_v19, %v719_v17  ;;  %729 = vst [vmem:[%s1163_s7] sm:$0x1] %v728_v20 }
 0x216   :  { %722 = vst [vmem:[%s1162_s6] sm:$0x1] %v721_v21 }
 0x217   :  { %749 = vsyncpa [#allocation3], 1 }
 0x218   :  { %750 = vsyncpa [#allocation5], 1 }
 0x219   :  { %751 = vsyncpa [#allocation8], 1 }

</bundles_post_ra>
